<compile_context>
chip_gen: v7x
topology: tpu7x:2x2x1
jax: 0.10.0
libtpu: 0.0.40
codegen_flags: <defaults>
</compile_context>

<pallas_src>
import functools
import math

import jax
import jax.numpy as jnp
from jax import lax
from jax.experimental import pallas as pl
from jax.experimental.pallas import tpu as pltpu


def _flash_sdpa_kernel(q_ref, kv_ref, o_ref, q_sc, m_sc, l_sc, acc_sc, *,
                       scale, seq_len, tk, mask_k):
    """One (q-tile, k-tile) online-softmax step for one batch element.

    q_ref : (TQ, D)   kv_ref : (TK, D)   o_ref : (TQ, D)
    q_sc  : (TQ, D)   scaled-Q scratch (input dtype)
    m_sc, l_sc : (TQ, 1) f32 scratch    acc_sc : (TQ, D) f32 scratch
    """
    ki = pl.program_id(2)

    @pl.when(ki == 0)
    def _():
        # Hoisted: scale Q once per q-tile (q_ref is the same block for all ki).
        q_sc[...] = q_ref[...] * jnp.asarray(scale, dtype=q_ref.dtype)
        m_sc[...] = jnp.full_like(m_sc, -jnp.inf)
        l_sc[...] = jnp.zeros_like(l_sc)
        acc_sc[...] = jnp.zeros_like(acc_sc)

    q = q_sc[...]                                                # (TQ, D)
    kv = kv_ref[...]                                             # (TK, D)

    # Q @ K^T on the MXU, contracting the feature axes directly (no XLU
    # transpose of K); bf16 operands, f32 accumulation.
    s = lax.dot_general(q, kv, (((1,), (1,)), ((), ())),
                        preferred_element_type=jnp.float32)      # (TQ, TK) f32

    if mask_k:
        # Key tail masking (N not a multiple of TK): the last key tile reads
        # undefined VMEM past the DMA'd region.  Mask those logits to -inf and
        # zero the corresponding V rows so 0 * garbage cannot become NaN.
        col = ki * tk + lax.broadcasted_iota(jnp.int32, s.shape, 1)
        s = jnp.where(col < seq_len, s, -jnp.inf)
        row = ki * tk + lax.broadcasted_iota(jnp.int32, kv.shape, 0)
        kv = jnp.where(row < seq_len, kv, jnp.zeros_like(kv))

    # Online (streaming) softmax in f32.
    m_prev = m_sc[...]
    m_new = jnp.maximum(m_prev, jnp.max(s, axis=-1, keepdims=True))
    alpha = jnp.exp(m_prev - m_new)                              # (TQ, 1)
    p = jnp.exp(s - m_new)                                       # (TQ, TK) f32

    l_sc[...] = alpha * l_sc[...] + jnp.sum(p, axis=-1, keepdims=True)
    acc_sc[...] = alpha * acc_sc[...] + jnp.dot(
        p.astype(kv.dtype), kv, preferred_element_type=jnp.float32)
    m_sc[...] = m_new

    @pl.when(ki == pl.num_programs(2) - 1)
    def _():
        inv_l = pl.reciprocal(l_sc[...], approx=True)            # EUP slot, ~free
        o_ref[...] = (acc_sc[...] * inv_l).astype(o_ref.dtype)


def _round_up(n, m):
    return ((n + m - 1) // m) * m


def _cdiv(a, b):
    return (a + b - 1) // b


def _tile_defaults():
    """Generation-aware (TQ, TK, is_v5e) starting points.

    TQ governs the KV HBM stream (re-read N/TQ times); TK governs the P·V
    contraction length, the number of acc rescales, and per-step overhead.
    v6e/v7x: 256/512 feeds the 256-wide MXU; v5e (128-wide MXU, lowest HBM BW)
    keeps TK at 256 but does NOT shrink TQ.
    """
    kind = ""
    try:
        kind = jax.devices()[0].device_kind.lower()
    except Exception:
        pass
    is_v5e = ("v5" in kind) and ("lite" in kind or "5e" in kind)
    if is_v5e:
        return 256, 256, True
    return 256, 512, False


def _derive_vmem_limit(tq, tk, d, kbytes, obytes, kv_bufs):
    """VMEM request derived from the actual tile footprint (not hard-coded)."""
    lane = lambda n: _round_up(n, 128)
    sub = lambda n: _round_up(n, 8)
    dl = lane(d)
    est = 0
    est += 2 * sub(tq) * dl * kbytes            # Q blocks (double-buffered)
    est += kv_bufs * sub(tk) * dl * kbytes      # KV blocks (2- or 3-deep)
    est += 2 * sub(tq) * dl * obytes            # out blocks (double-buffered)
    est += sub(tq) * dl * kbytes                # scaled-Q scratch
    est += sub(tq) * dl * 4                     # f32 accumulator scratch
    est += 2 * sub(tq) * 128 * 4                # m, l scratch (lane-padded)
    est += 2 * sub(tq) * lane(tk) * 4           # (TQ,TK) f32 s/p intermediates
    # 4x headroom, clamped to stay well under v7x's 64 MiB physical VMEM.
    return int(min(48 * 1024 * 1024, max(16 * 1024 * 1024, 4 * est)))


def attention_forward(x, *, tq=None, tk=None):
    """x: (B, N, D) -> (B, N, D) scaled dot-product self-attention (Q=K=V=X)."""
    B, N, D = x.shape
    orig_dtype = x.dtype
    scale = 1.0 / math.sqrt(D)

    # Feed the MXU bf16 operands: f32 inputs are downcast once here, halving
    # the bytes of the KV stream that the kernel re-reads N/TQ times.  The
    # softmax math and all accumulation stay in f32 inside the kernel.
    if x.dtype in (jnp.float32, jnp.float64):
        x_k = x.astype(jnp.bfloat16)
    else:
        x_k = x
    kdtype = x_k.dtype

    tq_pref, tk_pref, is_v5e = _tile_defaults()
    if tq is not None:
        tq_pref = tq
    if tk is not None:
        tk_pref = tk

    n_pad8 = _round_up(N, 8)
    TQ = min(_round_up(tq_pref, 8), n_pad8)
    TK = min(_round_up(tk_pref, 8), n_pad8)

    # v7x has 2 TensorCores; the parallel axes are (B, N/TQ).  Make sure at
    # least 2 parallel blocks exist so neither core idles.
    while B * _cdiv(N, TQ) < 2 and TQ > 8:
        TQ = max(8, _round_up(TQ // 2, 8))

    grid = (B, _cdiv(N, TQ), _cdiv(N, TK))
    mask_k = (N % TK) != 0   # key-tail masking only when TK doesn't divide N

    kernel = functools.partial(_flash_sdpa_kernel, scale=scale, seq_len=N,
                               tk=TK, mask_k=mask_k)

    kv_index_map = lambda b, qi, ki: (b, ki, 0)
    kv_spec = pl.BlockSpec((pl.Squeezed(), TK, D), kv_index_map)
    kv_bufs = 2
    if is_v5e:
        # v5e: per-step KV DMA is comparable to per-step compute; a third
        # buffer is tens of KiB and hides any DMA exposure.
        try:
            kv_spec = pl.BlockSpec((pl.Squeezed(), TK, D), kv_index_map,
                                   pipeline_mode=pl.Buffered(3))
            kv_bufs = 3
        except TypeError:
            pass  # older BlockSpec signature; fall back to default buffering

    vmem_limit = _derive_vmem_limit(TQ, TK, D, jnp.dtype(kdtype).itemsize,
                                    jnp.dtype(orig_dtype).itemsize, kv_bufs)

    out = pl.pallas_call(
        kernel,
        out_shape=jax.ShapeDtypeStruct((B, N, D), orig_dtype),
        grid_spec=pltpu.PrefetchScalarGridSpec(
            num_scalar_prefetch=0,
            grid=grid,
            in_specs=[
                # X consumed twice: once as Q tiles, once as K/V tiles.
                # Last block dim == full array dim (D unpadded) is legal and
                # avoids the 128/D HBM inflation on the repeated KV stream.
                pl.BlockSpec((pl.Squeezed(), TQ, D),
                             lambda b, qi, ki: (b, qi, 0)),
                kv_spec,
            ],
            out_specs=pl.BlockSpec((pl.Squeezed(), TQ, D),
                                   lambda b, qi, ki: (b, qi, 0)),
            scratch_shapes=[
                pltpu.VMEM((TQ, D), kdtype),           # scaled Q (hoisted)
                pltpu.VMEM((TQ, 1), jnp.float32),      # running max m
                pltpu.VMEM((TQ, 1), jnp.float32),      # running denom l
                pltpu.VMEM((TQ, D), jnp.float32),      # running accumulator
            ],
        ),
        compiler_params=pltpu.CompilerParams(
            dimension_semantics=("parallel", "parallel", "arbitrary"),
            vmem_limit_bytes=vmem_limit,
        ),
    )(x_k, x_k)
    return out


def _reference(x):
    """Pure-JAX f32 reference for correctness checking."""
    xf = x.astype(jnp.float32)
    d = xf.shape[-1]
    s = jnp.einsum("bnd,bmd->bnm", xf, xf) / jnp.sqrt(jnp.float32(d))
    p = jax.nn.softmax(s, axis=-1)
    return jnp.einsum("bnm,bmd->bnd", p, xf).astype(x.dtype)


if __name__ == "__main__":
    key = jax.random.PRNGKey(0)

    # Tolerances reflect bf16 MXU operands (explicit downcast of f32 inputs)
    # plus the approximate EUP reciprocal in the softmax normalization.
    ATOL, RTOL = 3e-2, 2e-2

    # Small shape consistent with the module.
    B, N, D = 2, 8, 32
    x = jax.random.normal(key, (B, N, D), dtype=jnp.float32)
    out = jax.block_until_ready(attention_forward(x))
    ref = _reference(x)
    assert out.shape == (B, N, D) and out.dtype == x.dtype
    assert jnp.allclose(out, ref, atol=ATOL, rtol=RTOL), \
        float(jnp.max(jnp.abs(out - ref)))

    # Second case exercises multi-step online softmax + key-tail masking
    # (N not a multiple of TK) on the cdiv grid.
    B2, N2, D2 = 1, 200, 32
    x2 = jax.random.normal(jax.random.PRNGKey(1), (B2, N2, D2),
                           dtype=jnp.float32)
    out2 = jax.block_until_ready(attention_forward(x2, tq=64, tk=64))
    ref2 = _reference(x2)
    assert out2.shape == (B2, N2, D2)
    assert jnp.allclose(out2, ref2, atol=ATOL, rtol=RTOL), \
        float(jnp.max(jnp.abs(out2 - ref2)))

    print("KERNEL_OK")
</pallas_src>

<mosaic_0001>
module attributes {stable_mosaic.version = 11 : i64} {
  func.func @_flash_sdpa_kernel(%arg0: i32, %arg1: i32, %arg2: i32, %arg3: memref<1x8x32xbf16, #tpu.memory_space<vmem>>, %arg4: memref<1x8x32xbf16, #tpu.memory_space<vmem>>, %arg5: memref<1x8x32xf32, #tpu.memory_space<vmem>>, %arg6: memref<8x32xbf16, #tpu.memory_space<vmem>>, %arg7: memref<8x1xf32, #tpu.memory_space<vmem>>, %arg8: memref<8x1xf32, #tpu.memory_space<vmem>>, %arg9: memref<8x32xf32, #tpu.memory_space<vmem>>) attributes {dimension_semantics = [#tpu.dimension_semantics<parallel>, #tpu.dimension_semantics<parallel>, #tpu.dimension_semantics<arbitrary>], iteration_bounds = array<i64: 2, 1, 1>, scalar_prefetch = 0 : i64, scratch_operands = 4 : i64, tpu.core_type = #tpu.core_type<tc>, window_params = [{transform_indices = @transform_0, window_bounds = array<i64: 1, 8, 32>}, {transform_indices = @transform_1, window_bounds = array<i64: 1, 8, 32>}, {transform_indices = @transform_2, window_bounds = array<i64: 1, 8, 32>}]} {
    %c0_i32 = arith.constant 0 : i32
    %0 = arith.cmpi eq, %arg2, %c0_i32 : i32
    %1 = arith.extui %0 : i1 to i32
    %c0_i32_0 = arith.constant 0 : i32
    %2 = arith.cmpi ne, %1, %c0_i32_0 : i32
    scf.if %2 {
      %c0_22 = arith.constant 0 : index
      %c0_23 = arith.constant 0 : index
      %c0_24 = arith.constant 0 : index
      %33 = vector.load %arg3[%c0_22, %c0_23, %c0_24] : memref<1x8x32xbf16, #tpu.memory_space<vmem>>, vector<1x8x32xbf16>
      %34 = vector.shape_cast %33 : vector<1x8x32xbf16> to vector<8x32xbf16>
      %cst_25 = arith.constant 1.767580e-01 : bf16
      %35 = vector.broadcast %cst_25 : bf16 to vector<8x32xbf16>
      %36 = arith.mulf %34, %35 : vector<8x32xbf16>
      %c0_26 = arith.constant 0 : index
      %c0_27 = arith.constant 0 : index
      %37 = vector.load %arg6[%c0_26, %c0_27] : memref<8x32xbf16, #tpu.memory_space<vmem>>, vector<8x32xbf16>
      tpu.vector_store %arg6[%c0_26, %c0_27], %36 {strides = array<i32>} : memref<8x32xbf16, #tpu.memory_space<vmem>>, vector<8x32xbf16>,
      %cst_28 = arith.constant 0xFF800000 : f32
      %38 = vector.broadcast %cst_28 : f32 to vector<8x1xf32>
      %c0_29 = arith.constant 0 : index
      %c0_30 = arith.constant 0 : index
      %39 = vector.load %arg7[%c0_29, %c0_30] : memref<8x1xf32, #tpu.memory_space<vmem>>, vector<8x1xf32>
      tpu.vector_store %arg7[%c0_29, %c0_30], %38 {strides = array<i32>} : memref<8x1xf32, #tpu.memory_space<vmem>>, vector<8x1xf32>,
      %cst_31 = arith.constant 0.000000e+00 : f32
      %40 = vector.broadcast %cst_31 : f32 to vector<8x1xf32>
      %c0_32 = arith.constant 0 : index
      %c0_33 = arith.constant 0 : index
      %41 = vector.load %arg8[%c0_32, %c0_33] : memref<8x1xf32, #tpu.memory_space<vmem>>, vector<8x1xf32>
      tpu.vector_store %arg8[%c0_32, %c0_33], %40 {strides = array<i32>} : memref<8x1xf32, #tpu.memory_space<vmem>>, vector<8x1xf32>,
      %cst_34 = arith.constant 0.000000e+00 : f32
      %42 = vector.broadcast %cst_34 : f32 to vector<8x32xf32>
      %c0_35 = arith.constant 0 : index
      %c0_36 = arith.constant 0 : index
      %43 = vector.load %arg9[%c0_35, %c0_36] : memref<8x32xf32, #tpu.memory_space<vmem>>, vector<8x32xf32>
      tpu.vector_store %arg9[%c0_35, %c0_36], %42 {strides = array<i32>} : memref<8x32xf32, #tpu.memory_space<vmem>>, vector<8x32xf32>,
    } else {
    }
    %c0 = arith.constant 0 : index
    %c0_1 = arith.constant 0 : index
    %3 = vector.load %arg6[%c0, %c0_1] : memref<8x32xbf16, #tpu.memory_space<vmem>>, vector<8x32xbf16>
    %c0_2 = arith.constant 0 : index
    %c0_3 = arith.constant 0 : index
    %c0_4 = arith.constant 0 : index
    %4 = vector.load %arg4[%c0_2, %c0_3, %c0_4] : memref<1x8x32xbf16, #tpu.memory_space<vmem>>, vector<1x8x32xbf16>
    %5 = vector.shape_cast %4 : vector<1x8x32xbf16> to vector<8x32xbf16>
    %cst = arith.constant dense<0.000000e+00> : vector<8x8xf32>
    %6 = tpu.matmul %3, %5, %cst {dimension_numbers = #tpu.dot_dimension_numbers<[1], [1], [0], [0], [0, 0, 1, 0], [], []>} : vector<8x32xbf16>, vector<8x32xbf16>, vector<8x8xf32> -> vector<8x8xf32>
    %c0_5 = arith.constant 0 : index
    %c0_6 = arith.constant 0 : index
    %7 = vector.load %arg7[%c0_5, %c0_6] : memref<8x1xf32, #tpu.memory_space<vmem>>, vector<8x1xf32>
    %cst_7 = arith.constant dense<0xFF800000> : vector<8xf32>
    %8 = vector.multi_reduction <maximumf>, %6, %cst_7 [1] : vector<8x8xf32> to vector<8xf32>
    %9 = vector.shape_cast %8 : vector<8xf32> to vector<8x1xf32>
    %10 = arith.maximumf %7, %9 : vector<8x1xf32>
    %11 = arith.subf %7, %10 : vector<8x1xf32>
    %12 = math.exp %11 : vector<8x1xf32>
    %13 = vector.broadcast %10 : vector<8x1xf32> to vector<8x8xf32>
    %14 = arith.subf %6, %13 : vector<8x8xf32>
    %15 = math.exp %14 : vector<8x8xf32>
    %c0_8 = arith.constant 0 : index
    %c0_9 = arith.constant 0 : index
    %16 = vector.load %arg8[%c0_8, %c0_9] : memref<8x1xf32, #tpu.memory_space<vmem>>, vector<8x1xf32>
    %17 = arith.mulf %12, %16 : vector<8x1xf32>
    %cst_10 = arith.constant dense<0.000000e+00> : vector<8xf32>
    %18 = vector.multi_reduction <add>, %15, %cst_10 [1] : vector<8x8xf32> to vector<8xf32>
    %19 = vector.shape_cast %18 : vector<8xf32> to vector<8x1xf32>
    %20 = arith.addf %17, %19 : vector<8x1xf32>
    %c0_11 = arith.constant 0 : index
    %c0_12 = arith.constant 0 : index
    %21 = vector.load %arg8[%c0_11, %c0_12] : memref<8x1xf32, #tpu.memory_space<vmem>>, vector<8x1xf32>
    tpu.vector_store %arg8[%c0_11, %c0_12], %20 {strides = array<i32>} : memref<8x1xf32, #tpu.memory_space<vmem>>, vector<8x1xf32>,
    %c0_13 = arith.constant 0 : index
    %c0_14 = arith.constant 0 : index
    %22 = vector.load %arg9[%c0_13, %c0_14] : memref<8x32xf32, #tpu.memory_space<vmem>>, vector<8x32xf32>
    %23 = vector.broadcast %12 : vector<8x1xf32> to vector<8x32xf32>
    %24 = arith.mulf %23, %22 : vector<8x32xf32>
    %25 = arith.truncf %15 : vector<8x8xf32> to vector<8x8xbf16>
    %cst_15 = arith.constant dense<0.000000e+00> : vector<8x32xf32>
    %26 = tpu.matmul %25, %5, %cst_15 {dimension_numbers = #tpu.dot_dimension_numbers<[1], [0], [0], [1], [0, 0, 1, 1], [], []>} : vector<8x8xbf16>, vector<8x32xbf16>, vector<8x32xf32> -> vector<8x32xf32>
    %27 = arith.addf %24, %26 : vector<8x32xf32>
    %c0_16 = arith.constant 0 : index
    %c0_17 = arith.constant 0 : index
    %28 = vector.load %arg9[%c0_16, %c0_17] : memref<8x32xf32, #tpu.memory_space<vmem>>, vector<8x32xf32>
    tpu.vector_store %arg9[%c0_16, %c0_17], %27 {strides = array<i32>} : memref<8x32xf32, #tpu.memory_space<vmem>>, vector<8x32xf32>,
    %c0_18 = arith.constant 0 : index
    %c0_19 = arith.constant 0 : index
    %29 = vector.load %arg7[%c0_18, %c0_19] : memref<8x1xf32, #tpu.memory_space<vmem>>, vector<8x1xf32>
    tpu.vector_store %arg7[%c0_18, %c0_19], %10 {strides = array<i32>} : memref<8x1xf32, #tpu.memory_space<vmem>>, vector<8x1xf32>,
    %c0_i32_20 = arith.constant 0 : i32
    %30 = arith.cmpi eq, %arg2, %c0_i32_20 : i32
    %31 = arith.extui %30 : i1 to i32
    %c0_i32_21 = arith.constant 0 : i32
    %32 = arith.cmpi ne, %31, %c0_i32_21 : i32
    scf.if %32 {
      %c0_22 = arith.constant 0 : index
      %c0_23 = arith.constant 0 : index
      %33 = vector.load %arg8[%c0_22, %c0_23] : memref<8x1xf32, #tpu.memory_space<vmem>>, vector<8x1xf32>
      %34 = tpu.reciprocal %33 {approx = true} : vector<8x1xf32> -> vector<8x1xf32>
      %c0_24 = arith.constant 0 : index
      %c0_25 = arith.constant 0 : index
      %35 = vector.load %arg9[%c0_24, %c0_25] : memref<8x32xf32, #tpu.memory_space<vmem>>, vector<8x32xf32>
      %36 = vector.broadcast %34 : vector<8x1xf32> to vector<8x32xf32>
      %37 = arith.mulf %35, %36 : vector<8x32xf32>
      %c0_26 = arith.constant 0 : index
      %c0_27 = arith.constant 0 : index
      %c0_28 = arith.constant 0 : index
      %38 = vector.load %arg5[%c0_26, %c0_27, %c0_28] : memref<1x8x32xf32, #tpu.memory_space<vmem>>, vector<1x8x32xf32>
      %39 = vector.shape_cast %38 : vector<1x8x32xf32> to vector<8x32xf32>
      %40 = vector.shape_cast %37 : vector<8x32xf32> to vector<1x8x32xf32>
      tpu.vector_store %arg5[%c0_26, %c0_27, %c0_28], %40 {strides = array<i32>} : memref<1x8x32xf32, #tpu.memory_space<vmem>>, vector<1x8x32xf32>,
    } else {
    }
    return
  }
  func.func @transform_0(%arg0: i32, %arg1: i32, %arg2: i32) -> (i32, i32, i32) {
    %c0_i32 = arith.constant 0 : i32
    %c0_i32_0 = arith.constant 0 : i32
    return %arg0, %arg1, %c0_i32 : i32, i32, i32
  }
  func.func @transform_1(%arg0: i32, %arg1: i32, %arg2: i32) -> (i32, i32, i32) {
    %c0_i32 = arith.constant 0 : i32
    %c0_i32_0 = arith.constant 0 : i32
    return %arg0, %arg2, %c0_i32 : i32, i32, i32
  }
  func.func @transform_2(%arg0: i32, %arg1: i32, %arg2: i32) -> (i32, i32, i32) {
    %c0_i32 = arith.constant 0 : i32
    %c0_i32_0 = arith.constant 0 : i32
    return %arg0, %arg1, %c0_i32 : i32, i32, i32
  }
}

</mosaic_0001>

<bundles_post_ra>
// kernel: tpu_custom_call.1
= control target key start
LH: loop header
LB: loop body
LE: loop exit
PB: predicated region body
PF: predicated region fallthrough
CT: control target
= control target key end

     0   :  { %7 = vsyncpa [#allocation7], 0  ;;  %s1020_s0 = inlined_call_operand.hbm [shape: bf16[2,8,32], index: 0, kind: input, shape index: {}]   ;;  %s1021_s1 = inlined_call_operand.hbm [shape: bf16[2,8,32], index: 1, kind: input, shape index: {}]   ;;  %s1022_s2 = inlined_call_operand.hbm [shape: f32[2,8,32], index: 2, kind: output, shape index: {}]  }
   0x1   :  { %9 = vsyncpa [#allocation7 + $0x1], 0 }
   0x2   :  { %10 = vsyncpa [#allocation10], 0 }
   0x3   :  { %12 = vsyncpa [#allocation10 + $0x1], 0 }
   0x4   :  { %13 = vsyncpa [#allocation8], 0 }
   0x5   :  { %15 = vsyncpa [#allocation8 + $0x1], 0  ;;  %s787_s9 = smov 0   ;;  %s789_s10 = smov 0  }
   0x6   :  { %s791_s11 = smov 0   ;;  %s793_s12 = smov 0  }
   0x7   :  { %s795_s13 = smov 0   ;;  %s797_s14 = smov 0  }
   0x8 LB: > { %s504_s15 = sadd.s32 4294967295, %s763_s14   ;;  %s505_s16 = sadd.s32 4294967294, %s763_s14   ;;  %s763_s14 = sphi %s797_s14, %s21_s14   ;;  %s759_s13 = sphi %s795_s13, %s1042_s13   ;;  %s755_s12 = sphi %s793_s12, %s1041_s12   ;;  %s751_s11 = sphi %s791_s11, %s1040_s11   ;;  %s747_s10 = sphi %s789_s10, %s1039_s10   ;;  %s743_s9 = sphi %s787_s9, %s1038_s9  }
   0x9   : > { %s40_s17 = sadd.s32 1, %s759_s13  ;;  %s49_s18 = sadd.s32 1, %s751_s11 }
   0xa   : > { %p42_p0 = scmp.ge.s32.totalorder %s40_s17, 2  ;;  %p56_p1 = scmp.ne.s32.totalorder %s751_s11, %s747_s10 }
   0xb   : > { %p57_p2 = scmp.eq.s32.totalorder %s763_s14, 0  ;;  %p62_p3 = scmp.ne.s32.totalorder %s747_s10, %s743_s9 }
   0xc   : > { %s1044_s17 = smov (%p42_p0, %s40_s17), 0  ;;  %p63_p5 = scmp.eq.s32.totalorder %s504_s15, 0 }
   0xd   : > { %p828_p4 = por %p57_p2, %p56_p1  ;;  %s44_s20 = ssub.s32 %s759_s13, %s1044_s17 }
   0xe   : > { %p116_p6 = scmp.eq.s32.totalorder %s504_s15, 1  ;;  %p47_p7 = scmp.eq.s32.totalorder %s44_s20, 0 }
   0xf   : > { %p834_p8 = por %p63_p5, %p62_p3  ;;  %p122_p10 = scmp.eq.s32.totalorder %s505_s16, 1 }
  0x10   : > { %p838_p9 = por %p116_p6, %p56_p1  ;;  %p555_p13 = scmp.lt.s32.totalorder %s763_s14, 2 }
  0x11   : > { %s1026_s21 = scalar_select %p834_p8, 1, 0 }
  0x12   : > { %s1027_s22 = scalar_select %p838_p9, 1, 0 }
  0x13   : > { %s843_s23 = scalar_select %p47_p7, %s751_s11, %s49_s18  }
  0x14   : > { %p845_p11 = por %p122_p10, %p62_p3  ;;  %s852_s25 = sand.u32 1, %s751_s11  }
  0x15   : > { %s508_s26 = sshll.u32 %s852_s25, 2  ;;  %s509_s27 = sshll.u32 %s759_s13, 6 }
  0x16   : > { %s1028_s24 = scalar_select %p845_p11, 1, 0 }
  0x17   : > { %s861_s30 = scalar_lea.hbm %s1020_s0, %s509_s27  ;;  %s146_s3 = scalar_lea.vmem [#allocation6], %s508_s26 }
  0x18   : > { %s154_s4 = sshll.u32 %s146_s3, 4  ;;  %p869_p0 = pnand %p555_p13, %p828_p4  ;;  %s865_s4 = int_to_ptr.vmem [resolvable:$true] %s154_s4 }
  0x19   : > { %s143_s6 = scalar_lea.sflag [#allocation7], %s852_s25  ;;  %s617_s7 = scalar_lea.hbm %s861_s30, 64 }
  0x1a   : > { %p618_p3 = scmp.ne.s32.totalorder %s861_s30, %s617_s7  ;;  %p619_p5 = pneg %p869_p0 }
  0x1b   : > { %s622_s16 = scalar_lea.hbm %s1020_s0, 128  ;;  %p623_p4 = scmp.lt.u32.totalorder %s861_s30, %s1020_s0 }
  0x1c   : > { %p620_p6 = pnand %p619_p5, %p618_p3  ;;  %p624_p10 = scmp.lt.u32.totalorder %s622_s16, %s617_s7 }
  0x1d   : > { %p626_p12 = scmp.lt.u32.totalorder %s617_s7, %s861_s30 }
  0x1e   : > { %p621_p7 = pneg %p620_p6  ;;  %p625_p13 = por %p624_p10, %p623_p4 }
  0x20   : > { %p627_p1 = por %p626_p12, %p625_p13 }
  0x22   : > { %p628_p2 = pnand %p627_p1, %p621_p7 }
  0x24   : > { %631 = shalt.err (!%p628_p2)
}
  0x25   : > { %s632_s20 = scalar_lea.vmem %s865_s4, 64  ;;  %s765_s28 = smov [#allocation6]  }
  0x26   : > { %p633_p3 = scmp.ne.s32.totalorder %s865_s4, %s632_s20  ;;  %s637_s29 = sshll.u32 %s765_s28, 4  ;;  %s638_s29 = int_to_ptr.vmem [resolvable:$false] %s637_s29 }
  0x27   : > { %s639_s3 = scalar_lea.vmem %s638_s29, 128  ;;  %p640_p9 = scmp.lt.s32.totalorder %s865_s4, %s638_s29 }
  0x28   : > { %p635_p6 = pnand %p633_p3, %p619_p5  ;;  %p641_p4 = scmp.lt.s32.totalorder %s639_s3, %s632_s20 }
  0x2a   : > { %p636_p11 = pneg %p635_p6  ;;  %p642_p10 = por %p641_p4, %p640_p9 }
  0x2c   : > { %p643_p12 = pnand %p642_p10, %p636_p11 }
  0x2e   : > { %646 = shalt.err (!%p643_p12)
}
  0x2f   : > { %547 = dma.hbm_to_vmem [thread:$0]  (!%p869_p0), %s861_s30, 64, %s865_s4, %s143_s6  }
  0x30   : > { %p1030_p1 = scmp.lt.s32.totalorder %s763_s14, 3  ;;  %p1031_p2 = scmp.ge.s32.totalorder %s763_s14, 1 }
  0x31   : > { %s914_s16 = scalar_lea.hbm %s1021_s1, %s509_s27  ;;  %s165_s18 = scalar_lea.vmem [#allocation9], %s508_s26 }
  0x32   : > { %p905_p7 = pnand %p1031_p2, %p1030_p1  ;;  %s173_s19 = sshll.u32 %s165_s18, 4  ;;  %s174_s19 = int_to_ptr.vmem [resolvable:$true] %s173_s19 }
  0x33   : > { %s162_s30 = scalar_lea.sflag [#allocation10], %s852_s25  ;;  %s647_s4 = scalar_lea.hbm %s914_s16, 64 }
  0x34   : > { %s1032_s7 = scalar_select %p905_p7, 1, 0 }
  0x35   : > { %p648_p9 = scmp.ne.s32.totalorder %s914_s16, %s647_s4  ;;  %s652_s27 = scalar_lea.hbm %s1021_s1, 128 }
  0x36   : > { %p653_p3 = scmp.lt.u32.totalorder %s914_s16, %s1021_s1  ;;  %p654_p6 = scmp.lt.u32.totalorder %s652_s27, %s647_s4 }
  0x37   : > { %p650_p11 = pnand %p648_p9, %p619_p5  ;;  %p656_p10 = scmp.lt.u32.totalorder %s647_s4, %s914_s16 }
  0x38   : > { %p655_p4 = por %p654_p6, %p653_p3 }
  0x39   : > { %p651_p13 = pneg %p650_p11 }
  0x3a   : > { %p657_p12 = por %p656_p10, %p655_p4 }
  0x3c   : > { %p658_p1 = pnand %p657_p12, %p651_p13 }
  0x3e   : > { %661 = shalt.err (!%p658_p1)
}
  0x3f   : > { %s662_s25 = scalar_lea.vmem %s174_s19, 64  ;;  %s766_s26 = smov [#allocation9]  }
  0x40   : > { %p663_p2 = scmp.ne.s32.totalorder %s174_s19, %s662_s25  ;;  %s667_s3 = sshll.u32 %s766_s26, 4  ;;  %s668_s3 = int_to_ptr.vmem [resolvable:$false] %s667_s3 }
  0x41   : > { %s669_s8 = scalar_lea.vmem %s668_s3, 128  ;;  %p670_p8 = scmp.lt.s32.totalorder %s174_s19, %s668_s3 }
  0x42   : > { %p665_p9 = pnand %p663_p2, %p619_p5  ;;  %p671_p7 = scmp.lt.s32.totalorder %s669_s8, %s662_s25 }
  0x44   : > { %p666_p11 = pneg %p665_p9  ;;  %p672_p3 = por %p671_p7, %p670_p8 }
  0x46   : > { %p673_p6 = pnand %p672_p3, %p666_p11 }
  0x48   : > { %676 = shalt.err (!%p673_p6)
}
  0x49   : > { %550 = dma.hbm_to_vmem [thread:$0]  (!%p869_p0), %s914_s16, 64, %s174_s19, %s162_s30  }
  0x4a   : > { %p1033_p13 = scmp.ne.s32.totalorder %s1032_s7, 0 }
  0x4b   : > { %s941_s15 = sand.u32 (!%p1033_p13), 1, %s747_s10   ;;  %p1034_p5 = scmp.ne.s32.totalorder (!%p1033_p13), %s1026_s21, 0 }
  0x4c   : > { %182 = sbr.rel (%p1033_p13) target bundleno = 906 (0x38a), region = 28  ;;  %s513_s18 = sshll.u32 (!%p1033_p13), %s941_s15, 2 }
  0x4d   : > { %s185_s4 = scalar_lea.sflag (!%p1033_p13), [#allocation7], %s941_s15  ;;  %s188_s6 = scalar_lea.vmem (!%p1033_p13), [#allocation6], %s513_s18 }
  0x53   : > { %730 = dma.done.wait (%p1034_p5), %s185_s4, 64  }
  0x54   : > { %732 = vsyncadd (%p1034_p5), %s185_s4, 4294967232  ;;  %s194_s5 = scalar_lea.sflag [#allocation10], %s941_s15  ;;  %s197_s16 = scalar_lea.vmem [#allocation9], %s513_s18 }
  0x55   : > { %734 = dma.done.wait (%p1034_p5), %s194_s5, 64  }
  0x56   : > { %736 = vsyncadd (%p1034_p5), %s194_s5, 4294967232  ;;  %vm236_vm0 = vcmask 261120   ;;  %v767_v0 = vmov 0.0   ;;  %vm768_vm1 = vmmov 0   ;;  %v239_v1 = vld [vmem:[%s197_s16] sm:$0xf] }
  0x57   : > { %526 = vmatprep.subr.bf16.mxu0 %v767_v0  ;;  %237 = vst.msk [vmem:[#allocation5] sm:$0xff] %vm236_vm0, %v767_v0  ;;  %528 = vmatprep.mubr.msk.bf16.mxu0 %vm768_vm1, %v767_v0  ;;  %v229_v2 = vld [vmem:[%s188_s6] sm:$0xf]  ;;  %vm231_vm2 = vcmask 257024   ;;  %v245_v3 = vsel %vm236_vm0, %v239_v1, 0  ;;  %vm233_vm3 = vcmask 7168  }
  0x58   : > { %532 = vmatprep.subr.bf16.mxu1 %v767_v0  ;;  %534 = vmatprep.mubr.msk.bf16.mxu1 %vm768_vm1, %v767_v0  ;;  %v230_v4 = vmul.bf16 1043676725, %v229_v2  ;;  %v769_v6 = vmov -inf   ;;  %235 = vst.msk [vmem:[#allocation4] sm:$0xff] %vm233_vm3, %v767_v0  ;;  %vm288_vm4 = vcmask 64512   ;;  %v770_v12 = vmov 0  }
  0x59   : > { %527 = vmatpush3.bf16.xpose.msra.mxu0 %v245_v3  ;;  %234 = vst.msk [vmem:[#allocation3] sm:$0xff] %vm233_vm3, %v769_v6  ;;  %609 = vset.pattern.permute.xlu0 %v770_v12  ;;  %vm323_vm5 = vcmask 1043456   ;;  %s515_s21 = sshll.u32 %s941_s15, 3  ;;  %s519_s7 = sshll.u32 %s755_s12, 7 }
  0x5a   : > { %232 = vst.msk [vmem:[#allocation2] sm:$0xf] %vm231_vm2, %v230_v4  ;;  %610 = vset.pattern.permute.xlu1 %v770_v12  ;;  %v324_v17 = vsel %vm323_vm5, %v239_v1, 0  ;;  %s222_s19 = scalar_lea.vmem [#allocation11], %s515_s21  ;;  %s970_s28 = scalar_lea.hbm %s1022_s2, %s519_s7 }
  0x5b   : > { %533 = vmatpush3.bf16.msra.mxu1 %v324_v17  ;;  %s397_s30 = sshll.u32 %s222_s19, 4  ;;  %s383_s29 = scalar_lea.sflag [#allocation8], %s941_s15  ;;  %s972_s30 = int_to_ptr.vmem [resolvable:$true] %s397_s30 }
  0x5c   : > { %s677_s25 = scalar_lea.vmem %s972_s30, 128  ;;  %p1035_p0 = scmp.ne.s32.totalorder %s1027_s22, 0 }
  0x5d   : > { %p678_p8 = scmp.ne.s32.totalorder %s972_s30, %s677_s25  ;;  %s771_s12 = smov [#allocation11]  }
  0x5e   : > { %v312_v32 = vld [vmem:[#allocation5] sm:$0xff]  ;;  %s681_s26 = sshll.u32 %s771_s12, 4  ;;  %s682_s26 = int_to_ptr.vmem [resolvable:$false] %s681_s26 }
  0x5f   : > { %v304_v26 = vld [vmem:[#allocation4] sm:$0xff]  ;;  %p679_p7 = pnand %p678_p8, %p1035_p0  ;;  %s683_s3 = scalar_lea.vmem %s682_s26, 256 }
  0x60   : > { %v287_v13 = vld [vmem:[#allocation3] sm:$0xff]  ;;  %p684_p10 = scmp.lt.s32.totalorder %s972_s30, %s682_s26  ;;  %p685_p12 = scmp.lt.s32.totalorder %s683_s3, %s677_s25 }
  0x61   : > { %v238_v5 = vld [vmem:[#allocation2] sm:$0xf]  ;;  %p680_p4 = pneg %p679_p7 }
  0x62   : > { %529 = vmatmul.mubr.msk.bf16.vlgmr.msra.gmra.mrb[0].mxu0 %vm236_vm0, %v238_v5  ;;  %p686_p1 = por %p685_p12, %p684_p10 }
  0x64   : > { %p687_p2 = pnand %p686_p1, %p680_p4 }
 0x135   : > { %v281_v7 = vpop.f32.mrb[0].mxu0 }
 0x136   : > { %v530_v8 = vpop.f32.mrb[1].mxu0  ;;  %v289_v9 = vsel %vm288_vm4, %v281_v7, -inf }
 0x137   : > { %290 = vmax.xlane.f32.xlu0 %v289_v9  ;;  %v284_v10 = vpop.f32.mrb[2].mxu0 }
 0x138   : > { %v531_v11 = vpop.f32.mrb[3].mxu0 }
 0x1c4   : > { %v291_v14 = vpop.xlane.xlu0 %290 }
 0x1c5   : > { %v292_v15 = vmax.f32 %v287_v13, %v291_v14 }
 0x1c7   : > { %v293_v16 = vsub.f32 %v287_v13, %v292_v15  ;;  %368 = vst.msk [vmem:[#allocation3] sm:$0xff] %vm233_vm3, %v292_v15  ;;  %298 = vperm.xlu0 %609, %v292_v15  }
 0x1c9   : > { %v294_v24 = vmul.f32 1.442695, %v293_v16 }
 0x246   : > { %v299_v18 = vpop.permute.xlu0 %298 }
 0x247   : > { %v301_v19 = vsub.f32 %v281_v7, %v299_v18 }
 0x249   : > { %v302_v20 = vmul.f32 1.442695, %v301_v19 }
 0x24b   : > { %611 = vpow2.f32 %v302_v20 }
 0x24c   : > { %613 = vpow2.f32 %v294_v24 }
 0x255   : > { %v612_v21 = vpop.eup %611 }
 0x256   : > { %v306_v22 = vsel %vm288_vm4, %v612_v21, 0.0  ;;  %v319_v23 = vpack.c.bf16 %v612_v21, %v612_v21  ;;  %v614_v25 = vpop.eup %613 }
 0x257   : > { %307 = vadd.xlane.f32.xlu1 %v306_v22  ;;  %v305_v27 = vmul.f32 %v614_v25, %v304_v26 }
 0x258   : > { %535 = vmatmul.mubr.msk.bf16.vlgmr.msra.gmra.mrb[0].mxu1 %vm288_vm4, %v319_v23 }
 0x268   : > { %315 = vperm.xlu1 %610, %v614_v25  }
 0x2e4   : > { %v308_v28 = vpop.xlane.xlu1 %307 }
 0x2e5   : > { %v309_v29 = vadd.f32 %v308_v28, %v305_v27 }
 0x2e7   : > { %311 = vst.msk [vmem:[#allocation4] sm:$0xff] %vm233_vm3, %v309_v29 }
 0x2e8   : > { %v316_v33 = vpop.permute.xlu1 %315 }
 0x2e9   : > { %v318_v34 = vmul.f32 %v316_v33, %v312_v32 }
 0x2ee   : > { %v372_v30 = vld [vmem:[#allocation4] sm:$0xff] }
 0x2ef   : > { %615 = vrcp.f32 %v372_v30 }
 0x2f9   : > { %v616_v31 = vpop.eup %615 }
 0x2fa   : > { %377 = vperm.xlu1 %610, %v616_v31  }
 0x32b   : > { %v360_v35 = vpop.f32.mrb[0].mxu1 }
 0x32c   : > { %v366_v36 = vadd.f32 %v360_v35, %v318_v34  ;;  %v536_v37 = vpop.f32.mrb[1].mxu1 }
 0x32d   : > { %v363_v38 = vpop.f32.mrb[2].mxu1 }
 0x32e   : > { %367 = vst.msk [vmem:[#allocation5] sm:$0xff] %vm236_vm0, %v366_v36  ;;  %v537_v39 = vpop.f32.mrb[3].mxu1 }
 0x335   : > { %v374_v40 = vld [vmem:[#allocation5] sm:$0xff] }
 0x379   : > { %v378_v41 = vpop.permute.xlu1 %377 }
 0x37a   : > { %v380_v42 = vmul.f32 %v378_v41, %v374_v40 }
 0x37c   : > { %381 = vst.msk [vmem:[%s222_s19] sm:$0xff] %vm236_vm0, %v380_v42 }
 0x37d   : > { %690 = shalt.err (!%p687_p2)
}
 0x37e   : > { %s691_s8 = scalar_lea.hbm %s970_s28, 128  ;;  %s695_s4 = scalar_lea.hbm %s1022_s2, 256 }
 0x37f   : > { %p692_p9 = scmp.ne.s32.totalorder %s970_s28, %s691_s8  ;;  %p696_p6 = scmp.lt.u32.totalorder %s970_s28, %s1022_s2 }
 0x380   : > { %p697_p13 = scmp.lt.u32.totalorder %s695_s4, %s691_s8  ;;  %p699_p8 = scmp.lt.u32.totalorder %s691_s8, %s970_s28 }
 0x381   : > { %p693_p11 = pnand %p692_p9, %p1035_p0 }
 0x382   : > { %p698_p5 = por %p697_p13, %p696_p6 }
 0x383   : > { %p694_p3 = pneg %p693_p11 }
 0x384   : > { %p700_p7 = por %p699_p8, %p698_p5 }
 0x386   : > { %p701_p4 = pnand %p700_p7, %p694_p3 }
 0x388   : > { %704 = shalt.err (!%p701_p4)
}
 0x389   : > { %542 = dma.vmem_to_hbm [thread:$0]  (%p1035_p0), %s972_s30, 128, %s970_s28, %s383_s29  }
 0x38a PF: > { %s409_s16 = sand.u32 1, %s743_s9   ;;  %p1036_p10 = scmp.ne.s32.totalorder %s1028_s24, 0 }
 0x38b   : > { %p1037_p12 = scmp.ge.s32.totalorder %s763_s14, 2  ;;  %s410_s21 = scalar_lea.sflag [#allocation8], %s409_s16 }
 0x38d   : > { %p552_p1 = pnand %p1037_p12, %p1036_p10 }
 0x38f   : > { %738 = dma.done.wait (!%p552_p1), %s410_s21, 128  }
 0x390   : > { %740 = vsyncadd (!%p552_p1), %s410_s21, 4294967168  ;;  %s21_s14 = sadd.s32 1, %s763_s14   ;;  %s1038_s9 = smov %s747_s10 }
 0x391   : > { %p18_p2 = scmp.ge.s32.totalorder %s21_s14, 4   ;;  %s1039_s10 = smov %s751_s11 }
 0x392   : > { %s1040_s11 = smov %s843_s23  ;;  %s1041_s12 = smov %s759_s13 }
 0x393   : > { %s1042_s13 = smov %s1044_s17  ;;  %20 = sbr.rel (!%p18_p2) target bundleno = 8 (0x8), region = 94 }
 0x39a   :  { %415 = vsyncpa [#allocation7], 1 }
 0x39b   :  { %417 = vsyncpa [#allocation7 + $0x1], 1 }
 0x39c   :  { %418 = vsyncpa [#allocation10], 1 }
 0x39d   :  { %420 = vsyncpa [#allocation10 + $0x1], 1 }
 0x39e   :  { %421 = vsyncpa [#allocation8], 1 }
 0x39f   :  { %423 = vsyncpa [#allocation8 + $0x1], 1 }

</bundles_post_ra>
